<compile_context>
chip_gen: v5e
topology: v5e:2x2
jax: 0.10.0
libtpu: 0.0.40
codegen_flags: <defaults>
</compile_context>

<pallas_src>
import functools
import math

import numpy as np

import jax
import jax.numpy as jnp
from jax.experimental import pallas as pl
from jax.experimental.pallas import tpu as pltpu


# ---------------------------------------------------------------------------
# Hardware helpers
# ---------------------------------------------------------------------------
def _sublane_multiple(dtype) -> int:
    """Row granularity so vregs are fully packed (f32:8, bf16:16, int8/fp8:32)."""
    itemsize = jnp.dtype(dtype).itemsize
    return max(8, 32 // max(itemsize, 1))


def _tpu_generation_defaults():
    """(per-TensorCore VMEM bytes, TensorCores per device) from device_kind."""
    kind = ""
    try:
        kind = jax.devices()[0].device_kind.lower()
    except Exception:
        pass
    if "v7" in kind or "7x" in kind:
        return 64 * 1024 * 1024, 2
    if "v4" in kind or "v5p" in kind:
        return 128 * 1024 * 1024, 2
    if "v5" in kind or "v6" in kind:
        return 128 * 1024 * 1024, 1
    # Unknown generation: be conservative on VMEM, assume a single core.
    return 64 * 1024 * 1024, 1


def _vmem_capacity_bytes() -> int:
    """Per-TensorCore VMEM; clamp reported value against generation default in
    case get_tpu_info reports a per-chip figure (review concern on v7x)."""
    gen_cap, _ = _tpu_generation_defaults()
    try:
        info = pltpu.get_tpu_info()
        cap = getattr(info, "vmem_capacity_bytes", None)
        if cap:
            return int(min(int(cap), gen_cap))
    except Exception:
        pass
    return gen_cap


def _vmem_limit(footprint_bytes: int) -> int:
    """vmem_limit_bytes clamped to 75% of per-TC VMEM (<= ~48 MiB on v7x)."""
    cap = _vmem_capacity_bytes()
    return int(min(int(cap * 0.75), max(footprint_bytes + (8 << 20), 32 << 20)))


# ---------------------------------------------------------------------------
# Fused RMSNorm + matmul kernel  (the structural win from the review)
# ---------------------------------------------------------------------------
def _rmsnorm_matmul_kernel(x_ref, g_ref, w_ref, o_ref, xn_ref, *, eps):
    # x_ref: (tm, K) full-K row tile, g_ref: (1, K) f32 norm gain (pre-cast),
    # w_ref: (K, tn) projection tile, xn_ref: (tm, K) scratch (x.dtype).
    j = pl.program_id(1)

    @pl.when(j == 0)  # normalize once per row tile, reuse across all N tiles
    def _():
        xf = x_ref[...].astype(jnp.float32)
        inv = jax.lax.rsqrt(jnp.mean(xf * xf, axis=-1, keepdims=True) + eps)
        xn_ref[...] = (xf * inv * g_ref[...]).astype(xn_ref.dtype)

    o_ref[...] = jnp.dot(xn_ref[...], w_ref[...],
                         preferred_element_type=jnp.float32).astype(o_ref.dtype)


def _pick_tiles_mn(m, n, k, x_dtype, w_dtype, out_dtype):
    """Pick (tm, tn, vmem_footprint) for the full-K matmul-style kernels."""
    sub = _sublane_multiple(x_dtype)
    xsz = jnp.dtype(x_dtype).itemsize
    wsz = jnp.dtype(w_dtype).itemsize
    osz = jnp.dtype(out_dtype).itemsize
    cap = _vmem_capacity_bytes()
    _, n_cores = _tpu_generation_defaults()
    budget = int(cap * 0.7)  # ~30% headroom for Mosaic internal scratch

    m_padded = max(sub, pl.cdiv(m, sub) * sub)
    tm = min(m_padded, 512)
    if n % 128 == 0:
        tn = min(n, 512)
    else:
        tn = n  # ragged lane extent taken whole (legal: equals the full dim)

    if n_cores > 1:
        # v7x megacore: >= 2 near-equal row blocks per TensorCore, but never
        # shrink a block below ~2 MiB of per-step DMA.
        min_rows = pl.cdiv(pl.cdiv(2 << 20, max(k * xsz, 1)), sub) * sub
        balanced = pl.cdiv(pl.cdiv(m_padded, 2 * n_cores), sub) * sub
        tm = min(tm, max(balanced, min_rows))
    tm = max(sub, (tm // sub) * sub)

    def fp(tm_, tn_):
        # double-buffered x + normalized-x scratch + double-buffered rhs/out + gain
        return 3 * tm_ * k * xsz + 2 * k * tn_ * wsz + 2 * tm_ * tn_ * osz + k * 4

    while fp(tm, tn) > budget and tm > sub:
        tm = max(sub, ((tm // 2) // sub) * sub)
    while fp(tm, tn) > budget and tn % 128 == 0 and tn > 128:
        tn = max(128, ((tn // 2) // 128) * 128)
    return int(tm), int(tn), int(fp(tm, tn))


def rmsnorm_matmul(x, norm_weight, proj_weight, *, eps=1e-6, out_dtype=None):
    """out = (RMSNorm(x) * norm_weight) @ proj_weight, fused in one kernel."""
    m, k = x.shape
    k2, n = proj_weight.shape
    assert k == k2 and norm_weight.shape == (k,)
    out_dtype = out_dtype or x.dtype
    tm, tn, footprint = _pick_tiles_mn(m, n, k, x.dtype, proj_weight.dtype, out_dtype)
    grid = (pl.cdiv(m, tm), pl.cdiv(n, tn))
    g = norm_weight.astype(jnp.float32).reshape(1, k)  # pre-cast once (review)

    xsz = jnp.dtype(x.dtype).itemsize
    wsz = jnp.dtype(proj_weight.dtype).itemsize
    osz = jnp.dtype(out_dtype).itemsize
    cost = pl.CostEstimate(
        flops=2 * m * n * k + 4 * m * k,
        transcendentals=m,
        bytes_accessed=m * k * xsz + k * n * wsz + m * n * osz + k * 4,
    )

    return pl.pallas_call(
        functools.partial(_rmsnorm_matmul_kernel, eps=eps),
        out_shape=jax.ShapeDtypeStruct((m, n), out_dtype),
        grid_spec=pltpu.PrefetchScalarGridSpec(
            num_scalar_prefetch=0,
            grid=grid,
            in_specs=[
                pl.BlockSpec((tm, k), lambda i, j: (i, 0)),
                pl.BlockSpec((1, k), lambda i, j: (0, 0)),
                pl.BlockSpec((k, tn), lambda i, j: (0, j)),
            ],
            out_specs=pl.BlockSpec((tm, tn), lambda i, j: (i, j)),
            scratch_shapes=[pltpu.VMEM((tm, k), x.dtype)],
        ),
        compiler_params=pltpu.CompilerParams(
            # j must stay "arbitrary": the normalized-LHS scratch is filled at
            # j == 0 and reused across the N tiles of the same row block.
            dimension_semantics=("parallel", "arbitrary"),
            vmem_limit_bytes=_vmem_limit(footprint),
        ),
        cost_estimate=cost,
    )(x, g, proj_weight)


# ---------------------------------------------------------------------------
# Plain projection matmul kernel (wo, w2)
# ---------------------------------------------------------------------------
def _matmul_kernel(x_ref, w_ref, o_ref):
    o_ref[...] = jnp.dot(x_ref[...], w_ref[...],
                         preferred_element_type=jnp.float32).astype(o_ref.dtype)


def matmul(x, w, out_dtype=None):
    # TODO(synk): for very large K this should K-tile with an f32 accumulator.
    m, k = x.shape
    _, n = w.shape
    out_dtype = out_dtype or x.dtype
    tm, tn, footprint = _pick_tiles_mn(m, n, k, x.dtype, w.dtype, out_dtype)
    grid = (pl.cdiv(m, tm), pl.cdiv(n, tn))
    xsz = jnp.dtype(x.dtype).itemsize
    cost = pl.CostEstimate(
        flops=2 * m * n * k,
        transcendentals=0,
        bytes_accessed=m * k * xsz + k * n * jnp.dtype(w.dtype).itemsize
        + m * n * jnp.dtype(out_dtype).itemsize,
    )
    return pl.pallas_call(
        _matmul_kernel,
        out_shape=jax.ShapeDtypeStruct((m, n), out_dtype),
        grid_spec=pltpu.PrefetchScalarGridSpec(
            num_scalar_prefetch=0,
            grid=grid,
            in_specs=[
                pl.BlockSpec((tm, k), lambda i, j: (i, 0)),
                pl.BlockSpec((k, tn), lambda i, j: (0, j)),
            ],
            out_specs=pl.BlockSpec((tm, tn), lambda i, j: (i, j)),
        ),
        compiler_params=pltpu.CompilerParams(
            dimension_semantics=("parallel", "parallel"),
            vmem_limit_bytes=_vmem_limit(footprint),
        ),
        cost_estimate=cost,
    )(x, w)


# ---------------------------------------------------------------------------
# Standalone RMSNorm kernel (utility; review fixes applied)
# ---------------------------------------------------------------------------
def _rmsnorm_kernel(x_ref, w_ref, o_ref, *, eps):
    x = x_ref[...].astype(jnp.float32)
    inv = jax.lax.rsqrt(jnp.mean(x * x, axis=-1, keepdims=True) + eps)
    o_ref[...] = (x * inv * w_ref[...]).astype(o_ref.dtype)  # w pre-cast to f32


def _pick_tile_rows(n, dim, dtype):
    sub = _sublane_multiple(dtype)
    itemsize = jnp.dtype(dtype).itemsize
    cap = _vmem_capacity_bytes()
    _, n_cores = _tpu_generation_defaults()
    budget = int(cap * 0.7)                 # ~30% headroom (was 50%)
    bytes_per_row = 2 * 2 * dim * itemsize  # double-buffered in + out only
    tile = max(sub, budget // max(bytes_per_row, 1))
    tile = min(tile, 1024)                  # 512-1024 rows ~ HBM roofline
    if n_cores > 1:
        # >= 2 near-equal blocks per TensorCore; never below ~2 MiB per step.
        min_rows = pl.cdiv(pl.cdiv(2 << 20, max(dim * itemsize, 1)), sub) * sub
        balanced = pl.cdiv(pl.cdiv(n, 2 * n_cores), sub) * sub
        tile = min(tile, max(balanced, min_rows))
    tile = max(sub, (tile // sub) * sub)
    tile = min(tile, max(sub, pl.cdiv(n, sub) * sub))  # never exceed the data
    return int(tile)


def rmsnorm(x, weight, eps=1e-6, tile_rows=None):
    orig_shape = x.shape
    dim = orig_shape[-1]
    x2 = x.reshape(-1, dim)
    n = x2.shape[0]
    itemsize = jnp.dtype(x.dtype).itemsize
    sub = _sublane_multiple(x.dtype)
    if tile_rows is None:
        tile_rows = _pick_tile_rows(n, dim, x.dtype)
    else:
        tile_rows = max(sub, (int(tile_rows) // sub) * sub)
    grid = (pl.cdiv(n, tile_rows),)          # ragged tail masked by Pallas
    w2 = weight.astype(jnp.float32).reshape(1, dim)   # pre-cast once (review)

    pipeline_bytes = 2 * 2 * tile_rows * dim * itemsize + dim * 4
    cost = pl.CostEstimate(flops=4 * n * dim, transcendentals=n,
                           bytes_accessed=2 * n * dim * itemsize + dim * 4)
    out = pl.pallas_call(
        functools.partial(_rmsnorm_kernel, eps=eps),
        out_shape=jax.ShapeDtypeStruct((n, dim), x.dtype),
        grid_spec=pltpu.PrefetchScalarGridSpec(
            num_scalar_prefetch=0,
            grid=grid,
            in_specs=[pl.BlockSpec((tile_rows, dim), lambda i: (i, 0)),
                      pl.BlockSpec((1, dim), lambda i: (0, 0))],
            out_specs=pl.BlockSpec((tile_rows, dim), lambda i: (i, 0)),
        ),
        compiler_params=pltpu.CompilerParams(
            dimension_semantics=("parallel",),
            vmem_limit_bytes=_vmem_limit(pipeline_bytes),
        ),
        cost_estimate=cost,
    )(x2, w2)
    return out.reshape(orig_shape)


def rmsnorm_ref(x, weight, eps=1e-6):
    xf = x.astype(jnp.float32)
    inv = jax.lax.rsqrt(jnp.mean(xf * xf, axis=-1, keepdims=True) + eps)
    return (xf * inv * weight.astype(jnp.float32)).astype(x.dtype)


# ---------------------------------------------------------------------------
# Attention kernel (per batch*head, causal / block-diagonal via additive bias)
# ---------------------------------------------------------------------------
def _attention_kernel(q_ref, k_ref, v_ref, b_ref, o_ref, *, scale):
    q = q_ref[0].astype(jnp.float32)                  # (S, Dh)
    k = k_ref[0].astype(jnp.float32)
    v = v_ref[0].astype(jnp.float32)
    s = jnp.dot(q, k.T, preferred_element_type=jnp.float32) * scale + b_ref[0]
    s = s - jnp.max(s, axis=-1, keepdims=True)
    p = jnp.exp(s)
    p = p / jnp.sum(p, axis=-1, keepdims=True)
    o_ref[0] = jnp.dot(p, v, preferred_element_type=jnp.float32).astype(o_ref.dtype)


def attention(xq, xk, xv, bias):
    """xq/xk/xv: (B, S, H, Dh); bias: (B, S, S) additive f32 mask."""
    # TODO(synk): production version should be a flash-attention kernel with
    # online softmax and KV tiling instead of a full (S, S) score tile.
    B, S, H, Dh = xq.shape
    q = jnp.transpose(xq, (0, 2, 1, 3)).reshape(B * H, S, Dh)
    k = jnp.transpose(xk, (0, 2, 1, 3)).reshape(B * H, S, Dh)
    v = jnp.transpose(xv, (0, 2, 1, 3)).reshape(B * H, S, Dh)
    out = pl.pallas_call(
        functools.partial(_attention_kernel, scale=1.0 / math.sqrt(Dh)),
        out_shape=jax.ShapeDtypeStruct((B * H, S, Dh), xq.dtype),
        grid_spec=pltpu.PrefetchScalarGridSpec(
            num_scalar_prefetch=0,
            grid=(B * H,),
            in_specs=[
                pl.BlockSpec((1, S, Dh), lambda i: (i, 0, 0)),
                pl.BlockSpec((1, S, Dh), lambda i: (i, 0, 0)),
                pl.BlockSpec((1, S, Dh), lambda i: (i, 0, 0)),
                pl.BlockSpec((1, S, S), lambda i: (i // H, 0, 0)),
            ],
            out_specs=pl.BlockSpec((1, S, Dh), lambda i: (i, 0, 0)),
        ),
        compiler_params=pltpu.CompilerParams(
            dimension_semantics=("parallel",),
        ),
    )(q, k, v, bias)
    return jnp.transpose(out.reshape(B, H, S, Dh), (0, 2, 1, 3))


# ---------------------------------------------------------------------------
# Plain-JAX pieces (rotary, embedding gather, mask construction)
# ---------------------------------------------------------------------------
def precompute_freqs(head_dim, end, theta=10000.0):
    freqs = 1.0 / (theta ** (jnp.arange(0, head_dim, 2)[: head_dim // 2]
                             .astype(jnp.float32) / head_dim))
    t = jnp.arange(end, dtype=jnp.float32)
    angles = jnp.outer(t, freqs)
    return jnp.cos(angles), jnp.sin(angles)


def apply_rotary_emb(xq, xk, cos, sin):
    # TODO(synk): could be fused into the QKV projection kernel via pltpu.roll.
    def rot(x):
        xf = x.astype(jnp.float32)
        xr = xf.reshape(*xf.shape[:-1], -1, 2)
        a, b = xr[..., 0], xr[..., 1]
        c = cos[None, :, None, :]
        s = sin[None, :, None, :]
        out = jnp.stack([a * c - b * s, a * s + b * c], axis=-1).reshape(xf.shape)
        return out.astype(x.dtype)
    return rot(xq), rot(xk)


def build_attn_bias(bsz, seqlen, seq_len_list=None, start_pos=0):
    """Additive (B, S, S) mask: block-diagonal causal, matching the spec."""
    if seq_len_list is None or len(seq_len_list) == 0:
        seq_len_list = [[seqlen]] * bsz
    if isinstance(seq_len_list[0], int):
        seq_len_list = [list(seq_len_list)] * bsz
    ii = np.arange(seqlen)[:, None]
    jj = np.arange(seqlen)[None, :]
    causal = jj <= (ii + start_pos)
    out = np.zeros((bsz, seqlen, seqlen), dtype=np.float32)
    for b in range(bsz):
        seg = np.concatenate([np.full((l,), s) for s, l in enumerate(seq_len_list[b])])
        assert seg.shape[0] == seqlen, "seq_len_list must sum to seqlen"
        allowed = causal & (seg[:, None] == seg[None, :])
        out[b] = np.where(allowed, 0.0, -1e30)
    return jnp.asarray(out)


# ---------------------------------------------------------------------------
# Transformer forward (Pallas path)
# ---------------------------------------------------------------------------
def transformer_forward(params, tokens, cfg, start_pos=0, seq_len_list=None):
    B, S = tokens.shape
    dim = cfg["dim"]
    H = cfg["n_heads"]
    n_kv = cfg["n_kv_heads"] or H
    Dh = dim // H
    n_rep = H // n_kv
    eps = cfg["norm_eps"]

    # TODO(synk): embedding gather stays in plain JAX.
    h = jnp.take(params["tok_embeddings"], tokens, axis=0)          # (B, S, dim)
    cos, sin = params["freqs_cos"][:S], params["freqs_sin"][:S]
    bias = build_attn_bias(B, S, seq_len_list, start_pos)

    for layer in params["layers"]:
        # ---- attention: fused RMSNorm + QKV projection ----
        h2 = h.reshape(B * S, dim)
        qkv = rmsnorm_matmul(h2, layer["attn_norm"], layer["wqkv"], eps=eps)
        xq = qkv[:, : H * Dh].reshape(B, S, H, Dh)
        xk = qkv[:, H * Dh: H * Dh + n_kv * Dh].reshape(B, S, n_kv, Dh)
        xv = qkv[:, H * Dh + n_kv * Dh:].reshape(B, S, n_kv, Dh)
        xq, xk = apply_rotary_emb(xq, xk, cos, sin)
        if n_rep > 1:                                               # repeat_kv
            xk = jnp.repeat(xk, n_rep, axis=2)
            xv = jnp.repeat(xv, n_rep, axis=2)
        attn = attention(xq, xk, xv, bias)                          # (B, S, H, Dh)
        attn2 = attn.reshape(B * S, H * Dh)
        h = h + matmul(attn2, layer["wo"]).reshape(B, S, dim)

        # ---- FFN: fused RMSNorm + (w1 | w3) projection, SwiGLU, w2 ----
        h2 = h.reshape(B * S, dim)
        w13 = rmsnorm_matmul(h2, layer["ffn_norm"], layer["w13"], eps=eps)
        hid = layer["w13"].shape[1] // 2
        # TODO(synk): fuse silu(gate)*up into the w2 matmul kernel prologue.
        ff = jax.nn.silu(w13[:, :hid]) * w13[:, hid:]
        h = h + matmul(ff, layer["w2"]).reshape(B, S, dim)

    # ---- final norm fused into the output head ----
    h2 = h.reshape(B * S, dim)
    logits = rmsnorm_matmul(h2, params["final_norm"], params["output"], eps=eps)
    logits = logits.reshape(B, S, -1)
    return logits[:, -1, :3]


# ---------------------------------------------------------------------------
# Pure-JAX reference forward (same math, for correctness checks)
# ---------------------------------------------------------------------------
def transformer_forward_ref(params, tokens, cfg, start_pos=0, seq_len_list=None):
    hp = jax.lax.Precision.HIGHEST
    B, S = tokens.shape
    dim = cfg["dim"]
    H = cfg["n_heads"]
    n_kv = cfg["n_kv_heads"] or H
    Dh = dim // H
    n_rep = H // n_kv
    eps = cfg["norm_eps"]

    h = jnp.take(params["tok_embeddings"], tokens, axis=0)
    cos, sin = params["freqs_cos"][:S], params["freqs_sin"][:S]
    bias = build_attn_bias(B, S, seq_len_list, start_pos)

    for layer in params["layers"]:
        xn = rmsnorm_ref(h, layer["attn_norm"], eps).reshape(B * S, dim)
        qkv = jnp.dot(xn, layer["wqkv"], precision=hp)
        xq = qkv[:, : H * Dh].reshape(B, S, H, Dh)
        xk = qkv[:, H * Dh: H * Dh + n_kv * Dh].reshape(B, S, n_kv, Dh)
        xv = qkv[:, H * Dh + n_kv * Dh:].reshape(B, S, n_kv, Dh)
        xq, xk = apply_rotary_emb(xq, xk, cos, sin)
        if n_rep > 1:
            xk = jnp.repeat(xk, n_rep, axis=2)
            xv = jnp.repeat(xv, n_rep, axis=2)
        q = jnp.transpose(xq, (0, 2, 1, 3)).astype(jnp.float32)
        k = jnp.transpose(xk, (0, 2, 1, 3)).astype(jnp.float32)
        v = jnp.transpose(xv, (0, 2, 1, 3)).astype(jnp.float32)
        s = jnp.einsum("bhqd,bhkd->bhqk", q, k, precision=hp) / math.sqrt(Dh)
        s = s + bias[:, None, :, :]
        p = jax.nn.softmax(s, axis=-1)
        att = jnp.einsum("bhqk,bhkd->bhqd", p, v, precision=hp)
        att = jnp.transpose(att, (0, 2, 1, 3)).reshape(B * S, H * Dh).astype(h.dtype)
        h = h + jnp.dot(att, layer["wo"], precision=hp).reshape(B, S, dim)

        xn = rmsnorm_ref(h, layer["ffn_norm"], eps).reshape(B * S, dim)
        w13 = jnp.dot(xn, layer["w13"], precision=hp)
        hid = layer["w13"].shape[1] // 2
        ff = jax.nn.silu(w13[:, :hid]) * w13[:, hid:]
        h = h + jnp.dot(ff, layer["w2"], precision=hp).reshape(B, S, dim)

    xn = rmsnorm_ref(h, params["final_norm"], eps).reshape(B * S, dim)
    logits = jnp.dot(xn, params["output"], precision=hp).reshape(B, S, -1)
    return logits[:, -1, :3]


# ---------------------------------------------------------------------------
# Parameter init (deterministic)
# ---------------------------------------------------------------------------
def init_params(key, cfg):
    dim = cfg["dim"]
    H = cfg["n_heads"]
    n_kv = cfg["n_kv_heads"] or H
    Dh = dim // H
    vocab = cfg["vocab_size"]
    hidden = int(2 * (4 * dim) / 3)
    if cfg.get("ffn_dim_multiplier") is not None:
        hidden = int(cfg["ffn_dim_multiplier"] * hidden)
    mo = cfg["multiple_of"]
    hidden = mo * ((hidden + mo - 1) // mo)

    def dense(k, shape, scale=0.05):
        return scale * jax.random.normal(k, shape, dtype=jnp.float32)

    def gain(k):
        return jnp.ones((dim,), jnp.float32) + 0.1 * jax.random.normal(k, (dim,))

    keys = iter(jax.random.split(key, 4 + cfg["n_layers"]))
    params = {
        "tok_embeddings": dense(next(keys), (vocab, dim), 0.1),
        "final_norm": gain(next(keys)),
        "output": dense(next(keys), (dim, vocab)),
        "layers": [],
    }
    cos, sin = precompute_freqs(Dh, cfg["max_seq_len"] * 2)
    params["freqs_cos"], params["freqs_sin"] = cos, sin
    for _ in range(cfg["n_layers"]):
        lk = jax.random.split(next(keys), 6)
        params["layers"].append({
            "attn_norm": gain(lk[0]),
            "wqkv": dense(lk[1], (dim, (H + 2 * n_kv) * Dh)),
            "wo": dense(lk[2], (H * Dh, dim)),
            "ffn_norm": gain(lk[3]),
            "w13": dense(lk[4], (dim, 2 * hidden)),
            "w2": dense(lk[5], (hidden, dim)),
        })
    return params


# ---------------------------------------------------------------------------
# Main
# ---------------------------------------------------------------------------
if __name__ == "__main__":
    cfg = dict(dim=32, n_layers=2, n_heads=4, n_kv_heads=2, vocab_size=64,
               multiple_of=32, ffn_dim_multiplier=None, norm_eps=1e-5,
               max_seq_len=16)
    batch, seq = 2, 8
    params = init_params(jax.random.PRNGKey(0), cfg)
    tokens = jax.random.randint(jax.random.PRNGKey(1), (batch, seq), 0,
                                cfg["vocab_size"])
    # Block-diagonal causal attention: batch 0 = one segment, batch 1 = [5, 3].
    seq_len_list = [[seq], [5, 3]]

    # --- standalone RMSNorm kernel sanity (utility path; ragged bf16 tail) ---
    xb = jax.random.normal(jax.random.PRNGKey(2), (2, 9, 128),
                           dtype=jnp.float32).astype(jnp.bfloat16)
    wg = 1.0 + 0.1 * jax.random.normal(jax.random.PRNGKey(3), (128,), jnp.float32)
    ob = jax.block_until_ready(rmsnorm(xb, wg, eps=1e-5))
    rb = rmsnorm_ref(xb, wg, eps=1e-5)
    assert ob.shape == xb.shape and ob.dtype == xb.dtype
    assert jnp.allclose(ob.astype(jnp.float32), rb.astype(jnp.float32),
                        atol=2e-2, rtol=2e-2), "standalone rmsnorm mismatch"

    # --- full transformer forward: Pallas kernels vs pure-JAX reference ---
    out = jax.block_until_ready(
        transformer_forward(params, tokens, cfg, seq_len_list=seq_len_list))
    ref = jax.block_until_ready(
        transformer_forward_ref(params, tokens, cfg, seq_len_list=seq_len_list))
    assert out.shape == (batch, 3), out.shape
    assert jnp.all(jnp.isfinite(out))
    assert jnp.allclose(out, ref, atol=1e-3, rtol=1e-2), (out, ref)

    print("KERNEL_OK")
</pallas_src>

<mosaic_0001>
module attributes {stable_mosaic.version = 11 : i64} {
  func.func @_rmsnorm_kernel(%arg0: i32, %arg1: memref<32x128xbf16, #tpu.memory_space<vmem>>, %arg2: memref<1x128xf32, #tpu.memory_space<vmem>>, %arg3: memref<32x128xbf16, #tpu.memory_space<vmem>>) attributes {dimension_semantics = [#tpu.dimension_semantics<parallel>], iteration_bounds = array<i64: 1>, scalar_prefetch = 0 : i64, scratch_operands = 0 : i64, tpu.core_type = #tpu.core_type<tc>, window_params = [{transform_indices = @transform_0, window_bounds = array<i64: 32, 128>}, {pipeline_mode = #tpu.pipeline_mode<synchronous>, transform_indices = @transform_1, window_bounds = array<i64: 1, 128>}, {transform_indices = @transform_2, window_bounds = array<i64: 32, 128>}]} {
    %c0 = arith.constant 0 : index
    %c0_0 = arith.constant 0 : index
    %0 = vector.load %arg1[%c0, %c0_0] : memref<32x128xbf16, #tpu.memory_space<vmem>>, vector<32x128xbf16>
    %1 = arith.extf %0 : vector<32x128xbf16> to vector<32x128xf32>
    %2 = arith.mulf %1, %1 : vector<32x128xf32>
    %cst = arith.constant dense<0.000000e+00> : vector<32xf32>
    %3 = vector.multi_reduction <add>, %2, %cst [1] : vector<32x128xf32> to vector<32xf32>
    %4 = vector.shape_cast %3 : vector<32xf32> to vector<32x1xf32>
    %cst_1 = arith.constant 1.280000e+02 : f32
    %5 = vector.broadcast %cst_1 : f32 to vector<32x1xf32>
    %6 = arith.divf %4, %5 : vector<32x1xf32>
    %cst_2 = arith.constant 9.99999974E-6 : f32
    %7 = vector.broadcast %cst_2 : f32 to vector<32x1xf32>
    %8 = arith.addf %6, %7 : vector<32x1xf32>
    %9 = math.rsqrt %8 : vector<32x1xf32>
    %10 = vector.broadcast %9 : vector<32x1xf32> to vector<32x128xf32>
    %11 = arith.mulf %1, %10 : vector<32x128xf32>
    %c0_3 = arith.constant 0 : index
    %c0_4 = arith.constant 0 : index
    %12 = vector.load %arg2[%c0_3, %c0_4] : memref<1x128xf32, #tpu.memory_space<vmem>>, vector<1x128xf32>
    %13 = vector.broadcast %12 : vector<1x128xf32> to vector<32x128xf32>
    %14 = arith.mulf %11, %13 : vector<32x128xf32>
    %15 = arith.truncf %14 : vector<32x128xf32> to vector<32x128xbf16>
    %c0_5 = arith.constant 0 : index
    %c0_6 = arith.constant 0 : index
    %16 = vector.load %arg3[%c0_5, %c0_6] : memref<32x128xbf16, #tpu.memory_space<vmem>>, vector<32x128xbf16>
    tpu.vector_store %arg3[%c0_5, %c0_6], %15 {strides = array<i32>} : memref<32x128xbf16, #tpu.memory_space<vmem>>, vector<32x128xbf16>,
    return
  }
  func.func @transform_0(%arg0: i32) -> (i32, i32) {
    %c0_i32 = arith.constant 0 : i32
    %c0_i32_0 = arith.constant 0 : i32
    return %arg0, %c0_i32 : i32, i32
  }
  func.func @transform_1(%arg0: i32) -> (i32, i32) {
    %c0_i32 = arith.constant 0 : i32
    %c0_i32_0 = arith.constant 0 : i32
    %c0_i32_1 = arith.constant 0 : i32
    return %c0_i32, %c0_i32_0 : i32, i32
  }
  func.func @transform_2(%arg0: i32) -> (i32, i32) {
    %c0_i32 = arith.constant 0 : i32
    %c0_i32_0 = arith.constant 0 : i32
    return %arg0, %c0_i32 : i32, i32
  }
}

</mosaic_0001>

<bundles_post_ra>
// kernel: tpu_custom_call.1
= control target key start
LH: loop header
LB: loop body
LE: loop exit
PB: predicated region body
PF: predicated region fallthrough
CT: control target
= control target key end

     0   :  { %7 = vsyncpa [#allocation3], 0  ;;  %s328_s0 = inlined_call_operand.hbm [shape: bf16[18,128], index: 0, kind: input, shape index: {}]   ;;  %s329_s1 = inlined_call_operand.hbm [shape: f32[1,128], index: 1, kind: input, shape index: {}]   ;;  %s330_s2 = inlined_call_operand.hbm [shape: bf16[18,128], index: 2, kind: output, shape index: {}]  }
   0x1   :  { %8 = vsyncpa [#allocation6], 0 }
   0x2   :  { %9 = vsyncpa [#allocation4], 0 }
   0x3   :  { %13 = vsyncadd [#allocation3], 64  ;;  %s14_s11 = sshll.u32 %s328_s0, 4  ;;  %s272_s12 = smov [#allocation2]   ;;  %s15_s11 = int_to_ptr.hbm [resolvable:$true] %s14_s11 }
   0x4   :  { %s16_s13 = sshll.u32 %s272_s12, 4  ;;  %s28_s16 = sshll.u32 %s329_s1, 4  ;;  %s17_s13 = int_to_ptr.vmem [resolvable:$true] %s16_s13  ;;  %s29_s16 = int_to_ptr.hbm [resolvable:$true] %s28_s16 }
   0x5   :  { %s273_s17 = smov 64   ;;  %s274_s18 = smov 4  }
   0x6   :  { %22 = dma.hbm_to_vmem [thread:$0]  %s15_s11, 192, %s17_s13, [#allocation3], %s273_s17, %s273_s17, %s274_s18  }
   0x7   :  { %s275_s19 = smov [#allocation5]  }
   0x8   :  { %s30_s20 = sshll.u32 %s275_s19, 4  ;;  %s31_s20 = int_to_ptr.vmem [resolvable:$true] %s30_s20 }
   0x9   :  { %33 = dma.hbm_to_vmem [thread:$0]  %s29_s16, 16, %s31_s20, [#allocation6]  }
   0xa   :  { %266 = dma.done.wait [#allocation3], 256  }
   0xb   :  { %267 = vsyncadd [#allocation3], 4294967040 }
   0xc   :  { %268 = dma.done.wait [#allocation6], 16  }
   0xd   :  { %269 = vsyncadd [#allocation6], 4294967280  ;;  %v175_v0 = vld [vmem:[#allocation2 + $0x8] sm:$0xff]   ;;  %v158_v1 = vld [vmem:[#allocation2] sm:$0xff]   ;;  %v276_v10 = vmov 128.0  }
   0xe   :  { %v302_v2 = vunpack.c.l.bf16 %v175_v0  ;;  %v304_v3 = vunpack.c.l.bf16 %v158_v1  ;;  %v310_v6 = vunpack.c.h.bf16 %v175_v0  ;;  %v312_v7 = vunpack.c.h.bf16 %v158_v1  ;;  %v183_v54 = vld [vmem:[#allocation5] ss:$0 sm:$0xff] }
   0xf   :  { %184 = vrcp.f32 %v276_v10 }
  0x10   :  { %v52_v4 = vmul.f32 %v302_v2, %v302_v2  ;;  %v50_v5 = vmul.f32 %v304_v3, %v304_v3  ;;  %v53_v8 = vmul.f32 %v310_v6, %v310_v6  ;;  %v51_v9 = vmul.f32 %v312_v7, %v312_v7 }
  0x12   :  { %58 = vadd.xlane.f32.xlu1 %v52_v4  ;;  %54 = vadd.xlane.f32.xlu0 %v50_v5 }
  0x15   :  { %v185_v11 = vpop.eup %184 }
  0x16   :  { %v63_v12 = vmul.f32 128.0, %v185_v11  ;;  %vm67_vm0 = vweird.f32 %v185_v11 }
  0x18   :  { %v64_v13 = vsub.f32 1.0, %v63_v12 }
  0x1a   :  { %60 = vadd.xlane.f32.xlu1 %v53_v8  ;;  %56 = vadd.xlane.f32.xlu0 %v51_v9  ;;  %v65_v14 = vmul.f32 %v185_v11, %v64_v13 }
  0x1c   :  { %v66_v15 = vadd.f32 %v185_v11, %v65_v14 }
  0x1e   :  { %v68_v16 = vsel %vm67_vm0, %v185_v11, %v66_v15 }
  0x85   :  { %v59_v17 = vpop.xlane.xlu1 %58  ;;  %v55_v18 = vpop.xlane.xlu0 %54 }
  0x86   :  { %v71_v19 = vmul.f32 %v68_v16, %v59_v17  ;;  %v69_v20 = vmul.f32 %v68_v16, %v55_v18 }
  0x88   :  { %v75_v21 = vadd.f32 1e-05, %v71_v19  ;;  %v73_v22 = vadd.f32 1e-05, %v69_v20 }
  0x8a   :  { %186 = vrsqrt.f32 %v75_v21  ;;  %vm103_vm3 = vweird.f32 %v75_v21  ;;  %vm83_vm5 = vweird.f32 %v73_v22 }
  0x8b   :  { %188 = vrsqrt.f32 %v73_v22 }
  0x8d   :  { %v61_v23 = vpop.xlane.xlu1 %60  ;;  %v57_v24 = vpop.xlane.xlu0 %56 }
  0x8e   :  { %v72_v25 = vmul.f32 %v68_v16, %v61_v23  ;;  %v70_v26 = vmul.f32 %v68_v16, %v57_v24 }
  0x90   :  { %v187_v27 = vpop.eup %186  ;;  %v76_v28 = vadd.f32 1e-05, %v72_v25  ;;  %v74_v29 = vadd.f32 1e-05, %v70_v26 }
  0x91   :  { %v189_v30 = vpop.eup %188  ;;  %v98_v31 = vmul.f32 %v187_v27, %v75_v21  ;;  %vm104_vm1 = vweird.f32 %v187_v27 }
  0x92   :  { %v78_v32 = vmul.f32 %v189_v30, %v73_v22  ;;  %190 = vrsqrt.f32 %v76_v28  ;;  %vm84_vm2 = vweird.f32 %v189_v30  ;;  %vm105_vm4 = vmor %vm103_vm3, %vm104_vm1  ;;  %vm113_vm9 = vweird.f32 %v76_v28 }
  0x93   :  { %v99_v33 = vmul.f32 %v187_v27, %v98_v31  ;;  %192 = vrsqrt.f32 %v74_v29  ;;  %vm85_vm6 = vmor %vm83_vm5, %vm84_vm2  ;;  %vm93_vm11 = vweird.f32 %v74_v29 }
  0x94   :  { %v79_v34 = vmul.f32 %v189_v30, %v78_v32 }
  0x95   :  { %v100_v35 = vmul.f32 0.5, %v99_v33 }
  0x96   :  { %v80_v36 = vmul.f32 0.5, %v79_v34 }
  0x97   :  { %v101_v37 = vsub.f32 1.5, %v100_v35 }
  0x98   :  { %v191_v38 = vpop.eup %190  ;;  %v81_v39 = vsub.f32 1.5, %v80_v36 }
  0x99   :  { %v193_v40 = vpop.eup %192  ;;  %v108_v41 = vmul.f32 %v191_v38, %v76_v28  ;;  %v102_v43 = vmul.f32 %v187_v27, %v101_v37  ;;  %vm114_vm7 = vweird.f32 %v191_v38 }
  0x9a   :  { %v88_v42 = vmul.f32 %v193_v40, %v74_v29  ;;  %v82_v45 = vmul.f32 %v189_v30, %v81_v39  ;;  %vm94_vm8 = vweird.f32 %v193_v40  ;;  %vm115_vm10 = vmor %vm113_vm9, %vm114_vm7 }
  0x9b   :  { %v109_v44 = vmul.f32 %v191_v38, %v108_v41  ;;  %v106_v49 = vsel %vm105_vm4, %v187_v27, %v102_v43  ;;  %vm95_vm12 = vmor %vm93_vm11, %vm94_vm8 }
  0x9c   :  { %v89_v46 = vmul.f32 %v193_v40, %v88_v42  ;;  %v86_v51 = vsel %vm85_vm6, %v189_v30, %v82_v45  ;;  %v119_v55 = vmul.f32 %v302_v2, %v106_v49 }
  0x9d   :  { %v110_v47 = vmul.f32 0.5, %v109_v44  ;;  %v117_v57 = vmul.f32 %v304_v3, %v86_v51 }
  0x9e   :  { %v90_v48 = vmul.f32 0.5, %v89_v46  ;;  %v127_v62 = vmul.f32 %v183_v54, %v119_v55 }
  0x9f   :  { %v111_v50 = vsub.f32 1.5, %v110_v47  ;;  %v125_v0 = vmul.f32 %v183_v54, %v117_v57 }
  0xa0   :  { %v91_v52 = vsub.f32 1.5, %v90_v48 }
  0xa1   :  { %v112_v53 = vmul.f32 %v191_v38, %v111_v50 }
  0xa2   :  { %v92_v56 = vmul.f32 %v193_v40, %v91_v52 }
  0xa3   :  { %v116_v58 = vsel %vm115_vm10, %v191_v38, %v112_v53 }
  0xa4   :  { %v120_v59 = vmul.f32 %v310_v6, %v116_v58  ;;  %v96_v60 = vsel %vm95_vm12, %v193_v40, %v92_v56 }
  0xa5   :  { %v118_v61 = vmul.f32 %v312_v7, %v96_v60 }
  0xa6   :  { %v128_v63 = vmul.f32 %v183_v54, %v120_v59 }
  0xa7   :  { %v126_v1 = vmul.f32 %v183_v54, %v118_v61 }
  0xa8   :  { %v173_v4 = vpack.c.bf16 %v128_v63, %v127_v62 }
  0xa9   :  { %v168_v5 = vpack.c.bf16 %v126_v1, %v125_v0 }
  0xaa   :  { %176 = vst [vmem:[#allocation7 + $0x8] sm:$0xff] %v173_v4  }
  0xab   :  { %169 = vst [vmem:[#allocation7] sm:$0xff] %v168_v5  }
  0xac   :  { %140 = vsyncadd [#allocation4], 64  ;;  %s143_s21 = sshll.u32 %s330_s2, 4  ;;  %s277_s22 = smov [#allocation7]   ;;  %s144_s21 = int_to_ptr.hbm [resolvable:$true] %s143_s21 }
  0xad   :  { %s141_s23 = sshll.u32 %s277_s22, 4  ;;  %s142_s23 = int_to_ptr.vmem [resolvable:$true] %s141_s23 }
  0xae   :  { %149 = dma.vmem_to_hbm [thread:$0]  %s142_s23, 192, %s144_s21, [#allocation4], %s273_s17, %s273_s17, %s274_s18  }
  0xaf   :  { %270 = dma.done.wait [#allocation4], 256  }
  0xb0   :  { %271 = vsyncadd [#allocation4], 4294967040 }
  0xb1   :  { %154 = vsyncpa [#allocation3], 1 }
  0xb2   :  { %155 = vsyncpa [#allocation6], 1 }
  0xb3   :  { %156 = vsyncpa [#allocation4], 1 }

</bundles_post_ra>
